<compile_context>
chip_gen: v5e
topology: v5e:2x2
jax: 0.10.0
libtpu: 0.0.40
codegen_flags: <defaults>
</compile_context>

<pallas_src>
import functools

import jax
import jax.numpy as jnp
from jax.experimental import pallas as pl
from jax.experimental.pallas import tpu as pltpu


# ----------------------------- Pallas kernel -------------------------------

def _kd_fused_kernel(patch_ref, convw_ref, convb_ref, fcw_ref, fcb_ref,
                     o_ref, acc_ref, *, inv_hw):
    """Fused conv3x3(im2col matmul)+ReLU -> GAP accumulate -> linear.

    patch_ref : (1, TM, K)      bf16 im2col patches for one batch's M-tile
    convw_ref : (K, Ncomb)      bf16 combined teacher|student conv weights
    convb_ref : (1, Ncomb)      f32  combined conv bias
    fcw_ref   : (2, Ncomb)      f32  block-diagonal fc weights (row0=tea,row1=stu)
    fcb_ref   : (2, 1)          f32  fc bias
    o_ref     : (1, 2, 1)       f32  [teacher, student] outputs for this batch
    acc_ref   : (1, Ncomb)      f32  VMEM scratch: per-batch channel sums
    """
    t = pl.program_id(1)

    @pl.when(t == 0)
    def _init():
        acc_ref[...] = jnp.zeros_like(acc_ref)

    # conv as matmul on the MXU: bf16 x bf16 -> f32 accumulate.
    feat = jnp.dot(patch_ref[0], convw_ref[...],
                   preferred_element_type=jnp.float32)          # (TM, Ncomb)
    feat = jnp.maximum(feat + convb_ref[...], 0.0)              # f32 epilogue

    # partial global-average-pool: accumulate channel sums for this tile.
    acc_ref[...] += jnp.sum(feat, axis=0, keepdims=True)        # (1, Ncomb)

    @pl.when(t == pl.num_programs(1) - 1)
    def _finalize():
        mean = acc_ref[...] * inv_hw                            # (1, Ncomb)
        # tiny projection on the VPU: (2, Ncomb)*(1, Ncomb) -> lane reduce.
        prod = fcw_ref[...] * mean                              # (2, Ncomb)
        out = jnp.sum(prod, axis=1, keepdims=True) + fcb_ref[...]  # (2, 1)
        o_ref[...] = out.reshape(o_ref.shape)                   # (1, 2, 1)


# ------------------------------ JAX wrappers --------------------------------

def _im2col_3x3_same(x_nhwc):
    """3x3, stride 1, pad 1 patch extraction.  Returns (B, H, W, 9*C)."""
    B, H, W, C = x_nhwc.shape
    xp = jnp.pad(x_nhwc, ((0, 0), (1, 1), (1, 1), (0, 0)))
    cols = []
    for dh in range(3):
        for dw in range(3):
            cols.append(xp[:, dh:dh + H, dw:dw + W, :])
    return jnp.concatenate(cols, axis=-1)


def _pick_tile_rows(hw, cap=512):
    """Largest sublane-aligned tile (<= cap) that evenly divides H*W."""
    for tm in (cap, 256, 128, 64, 32, 16, 8):
        if tm <= cap and tm <= hw and hw % tm == 0:
            return tm
    return hw  # full-extent block (always legal)


def _combine_params(tea, stu):
    """Concatenate teacher/student conv weights along N, build block-diag fc."""
    conv_w = jnp.concatenate([tea["conv_w"], stu["conv_w"]], axis=1)  # (K, 24)
    conv_b = jnp.concatenate([tea["conv_b"], stu["conv_b"]], axis=1)  # (1, 24)
    ct = tea["fc_w"].shape[0]
    cs = stu["fc_w"].shape[0]
    fc_w_t = jnp.zeros((2, ct + cs), jnp.float32)
    fc_w_t = fc_w_t.at[0, :ct].set(tea["fc_w"][:, 0])                 # teacher
    fc_w_t = fc_w_t.at[1, ct:].set(stu["fc_w"][:, 0])                 # student
    fc_b_t = jnp.stack([tea["fc_b"][0, 0], stu["fc_b"][0, 0]]).reshape(2, 1)
    return conv_w, conv_b, fc_w_t, fc_b_t


def _kd_fused_forward(x_nchw, conv_w, conv_b, fc_w_t, fc_b_t):
    """Run the fused teacher+student forward.  Returns (B, 2) f32."""
    B, C, H, W = x_nchw.shape
    HW = H * W

    x_nhwc = jnp.transpose(x_nchw, (0, 2, 3, 1)).astype(jnp.float32)
    patches = _im2col_3x3_same(x_nhwc)                    # (B, H, W, 9*C)
    K = patches.shape[-1]
    patches = patches.reshape(B, HW, K).astype(jnp.bfloat16)

    conv_w = conv_w.astype(jnp.bfloat16)                  # (K, Ncomb)
    ncomb = conv_w.shape[1]

    TM = _pick_tile_rows(HW)
    num_t = HW // TM

    kernel = functools.partial(_kd_fused_kernel, inv_hw=1.0 / float(HW))

    out = pl.pallas_call(
        kernel,
        out_shape=jax.ShapeDtypeStruct((B, 2, 1), jnp.float32),
        grid=(B, num_t),
        in_specs=[
            pl.BlockSpec((1, TM, K), lambda b, t: (b, t, 0)),      # patches tile
            pl.BlockSpec((K, ncomb), lambda b, t: (0, 0)),         # conv W (full)
            pl.BlockSpec((1, ncomb), lambda b, t: (0, 0)),         # conv b
            pl.BlockSpec((2, ncomb), lambda b, t: (0, 0)),         # fc W^T
            pl.BlockSpec((2, 1), lambda b, t: (0, 0)),             # fc b
        ],
        out_specs=pl.BlockSpec((1, 2, 1), lambda b, t: (b, 0, 0)), # resident over t
        scratch_shapes=[pltpu.VMEM((1, ncomb), jnp.float32)],
        compiler_params=pltpu.CompilerParams(
            dimension_semantics=("parallel", "arbitrary"),
            vmem_limit_bytes=32 * 1024 * 1024),
    )(patches, conv_w, conv_b, fc_w_t, fc_b_t)

    return out.reshape(B, 2)


def kd_model_forward(x_nchw, teacher_params, student_params,
                     freeze_teacher=True):
    conv_w, conv_b, fc_w_t, fc_b_t = _combine_params(teacher_params,
                                                     student_params)
    out = _kd_fused_forward(x_nchw, conv_w, conv_b, fc_w_t, fc_b_t)  # (B, 2)
    tea_out = out[:, 0:1]
    stu_out = out[:, 1:2]
    if freeze_teacher:
        # torch.no_grad() on the teacher path -> stop_gradient in JAX
        tea_out = jax.lax.stop_gradient(tea_out)
    return tea_out, stu_out


# ------------------------- reference (pure JAX, f32) -------------------------

def _reference_forward(x_nchw, teacher_params, student_params):
    def one(params):
        x_nhwc = jnp.transpose(x_nchw, (0, 2, 3, 1)).astype(jnp.float32)
        p = _im2col_3x3_same(x_nhwc)
        B, H, W, K = p.shape
        p2 = p.reshape(B, H * W, K)
        feat = jnp.maximum(
            jnp.einsum("bmk,kn->bmn", p2, params["conv_w"]) + params["conv_b"],
            0.0)
        mean = feat.mean(axis=1)                          # (B, Cout)
        return mean @ params["fc_w"] + params["fc_b"]     # (B, 1)
    return one(teacher_params), one(student_params)


# ------------------------------ param init ----------------------------------

def _make_params(key, cin, cout, num_classes=1):
    k1, k2 = jax.random.split(key, 2)
    kdim = 9 * cin
    return {
        # conv weight already in im2col layout (9*Cin, Cout)
        "conv_w": (jax.random.normal(k1, (kdim, cout), jnp.float32)
                   * (1.0 / jnp.sqrt(kdim))),
        "conv_b": jnp.zeros((1, cout), jnp.float32),
        "fc_w": (jax.random.normal(k2, (cout, num_classes), jnp.float32)
                 * (1.0 / jnp.sqrt(cout))),
        "fc_b": jnp.zeros((1, num_classes), jnp.float32),
    }


# --------------------------------- main --------------------------------------

if __name__ == "__main__":
    key = jax.random.PRNGKey(0)
    kx, kt, ks = jax.random.split(key, 3)

    B, C, H, W = 2, 4, 32, 32                       # HW=1024 -> 2 M-tiles/batch
    x = jax.random.normal(kx, (B, C, H, W), jnp.float32)   # NCHW, like PyTorch

    teacher_params = _make_params(kt, cin=C, cout=16, num_classes=1)
    student_params = _make_params(ks, cin=C, cout=8, num_classes=1)

    fwd = jax.jit(lambda xx: kd_model_forward(xx, teacher_params,
                                              student_params,
                                              freeze_teacher=True))
    tea_out, stu_out = fwd(x)
    jax.block_until_ready((tea_out, stu_out))

    assert tea_out.shape == (B, 1) and stu_out.shape == (B, 1)

    # sanity check against a pure-JAX f32 reference (kernel uses bf16 matmul)
    tea_ref, stu_ref = _reference_forward(x, teacher_params, student_params)
    assert jnp.allclose(tea_out, tea_ref, atol=5e-2, rtol=5e-2)
    assert jnp.allclose(stu_out, stu_ref, atol=5e-2, rtol=5e-2)

    print("KERNEL_OK")
</pallas_src>

<mosaic_0001>
module attributes {stable_mosaic.version = 11 : i64} {
  func.func @_kd_fused_kernel(%arg0: i32, %arg1: i32, %arg2: memref<1x512x36xbf16, #tpu.memory_space<vmem>>, %arg3: memref<36x24xbf16, #tpu.memory_space<vmem>>, %arg4: memref<1x24xf32, #tpu.memory_space<vmem>>, %arg5: memref<2x24xf32, #tpu.memory_space<vmem>>, %arg6: memref<2x1xf32, #tpu.memory_space<vmem>>, %arg7: memref<1x2x1xf32, #tpu.memory_space<vmem>>, %arg8: memref<1x24xf32, #tpu.memory_space<vmem>>) attributes {dimension_semantics = [#tpu.dimension_semantics<parallel>, #tpu.dimension_semantics<arbitrary>], iteration_bounds = array<i64: 2, 2>, scalar_prefetch = 0 : i64, scratch_operands = 1 : i64, tpu.core_type = #tpu.core_type<tc>, window_params = [{transform_indices = @transform_0, window_bounds = array<i64: 1, 512, 36>}, {pipeline_mode = #tpu.pipeline_mode<synchronous>, transform_indices = @transform_1, window_bounds = array<i64: 36, 24>}, {pipeline_mode = #tpu.pipeline_mode<synchronous>, transform_indices = @transform_2, window_bounds = array<i64: 1, 24>}, {pipeline_mode = #tpu.pipeline_mode<synchronous>, transform_indices = @transform_3, window_bounds = array<i64: 2, 24>}, {pipeline_mode = #tpu.pipeline_mode<synchronous>, transform_indices = @transform_4, window_bounds = array<i64: 2, 1>}, {transform_indices = @transform_5, window_bounds = array<i64: 1, 2, 1>}]} {
    %c0_i32 = arith.constant 0 : i32
    %0 = arith.cmpi eq, %arg1, %c0_i32 : i32
    %1 = arith.extui %0 : i1 to i32
    %c0_i32_0 = arith.constant 0 : i32
    %2 = arith.cmpi ne, %1, %c0_i32_0 : i32
    scf.if %2 {
      %cst_14 = arith.constant 0.000000e+00 : f32
      %20 = vector.broadcast %cst_14 : f32 to vector<1x24xf32>
      %c0_15 = arith.constant 0 : index
      %c0_16 = arith.constant 0 : index
      %21 = vector.load %arg8[%c0_15, %c0_16] : memref<1x24xf32, #tpu.memory_space<vmem>>, vector<1x24xf32>
      tpu.vector_store %arg8[%c0_15, %c0_16], %20 {strides = array<i32>} : memref<1x24xf32, #tpu.memory_space<vmem>>, vector<1x24xf32>,
    } else {
    }
    %c0 = arith.constant 0 : index
    %c0_1 = arith.constant 0 : index
    %c0_2 = arith.constant 0 : index
    %3 = vector.load %arg2[%c0, %c0_1, %c0_2] : memref<1x512x36xbf16, #tpu.memory_space<vmem>>, vector<1x512x36xbf16>
    %4 = vector.shape_cast %3 : vector<1x512x36xbf16> to vector<512x36xbf16>
    %c0_3 = arith.constant 0 : index
    %c0_4 = arith.constant 0 : index
    %5 = vector.load %arg3[%c0_3, %c0_4] : memref<36x24xbf16, #tpu.memory_space<vmem>>, vector<36x24xbf16>
    %cst = arith.constant dense<0.000000e+00> : vector<512x24xf32>
    %6 = tpu.matmul %4, %5, %cst {dimension_numbers = #tpu.dot_dimension_numbers<[1], [0], [0], [1], [0, 0, 1, 1], [], []>} : vector<512x36xbf16>, vector<36x24xbf16>, vector<512x24xf32> -> vector<512x24xf32>
    %c0_5 = arith.constant 0 : index
    %c0_6 = arith.constant 0 : index
    %7 = vector.load %arg4[%c0_5, %c0_6] : memref<1x24xf32, #tpu.memory_space<vmem>>, vector<1x24xf32>
    %8 = vector.broadcast %7 : vector<1x24xf32> to vector<512x24xf32>
    %9 = arith.addf %6, %8 : vector<512x24xf32>
    %cst_7 = arith.constant 0.000000e+00 : f32
    %10 = vector.broadcast %cst_7 : f32 to vector<512x24xf32>
    %11 = arith.maximumf %9, %10 : vector<512x24xf32>
    %c0_8 = arith.constant 0 : index
    %c0_9 = arith.constant 0 : index
    %12 = vector.load %arg8[%c0_8, %c0_9] : memref<1x24xf32, #tpu.memory_space<vmem>>, vector<1x24xf32>
    %cst_10 = arith.constant dense<0.000000e+00> : vector<24xf32>
    %13 = vector.multi_reduction <add>, %11, %cst_10 [0] : vector<512x24xf32> to vector<24xf32>
    %14 = vector.shape_cast %13 : vector<24xf32> to vector<1x24xf32>
    %15 = arith.addf %12, %14 : vector<1x24xf32>
    %c0_11 = arith.constant 0 : index
    %c0_12 = arith.constant 0 : index
    %16 = vector.load %arg8[%c0_11, %c0_12] : memref<1x24xf32, #tpu.memory_space<vmem>>, vector<1x24xf32>
    tpu.vector_store %arg8[%c0_11, %c0_12], %15 {strides = array<i32>} : memref<1x24xf32, #tpu.memory_space<vmem>>, vector<1x24xf32>,
    %c1_i32 = arith.constant 1 : i32
    %17 = arith.cmpi eq, %arg1, %c1_i32 : i32
    %18 = arith.extui %17 : i1 to i32
    %c0_i32_13 = arith.constant 0 : i32
    %19 = arith.cmpi ne, %18, %c0_i32_13 : i32
    scf.if %19 {
      %c0_14 = arith.constant 0 : index
      %c0_15 = arith.constant 0 : index
      %20 = vector.load %arg8[%c0_14, %c0_15] : memref<1x24xf32, #tpu.memory_space<vmem>>, vector<1x24xf32>
      %cst_16 = arith.constant 9.765625E-4 : f32
      %21 = vector.broadcast %cst_16 : f32 to vector<1x24xf32>
      %22 = arith.mulf %20, %21 : vector<1x24xf32>
      %c0_17 = arith.constant 0 : index
      %c0_18 = arith.constant 0 : index
      %23 = vector.load %arg5[%c0_17, %c0_18] : memref<2x24xf32, #tpu.memory_space<vmem>>, vector<2x24xf32>
      %24 = vector.broadcast %22 : vector<1x24xf32> to vector<2x24xf32>
      %25 = arith.mulf %23, %24 : vector<2x24xf32>
      %cst_19 = arith.constant dense<0.000000e+00> : vector<2xf32>
      %26 = vector.multi_reduction <add>, %25, %cst_19 [1] : vector<2x24xf32> to vector<2xf32>
      %27 = vector.shape_cast %26 : vector<2xf32> to vector<2x1xf32>
      %c0_20 = arith.constant 0 : index
      %c0_21 = arith.constant 0 : index
      %28 = vector.load %arg6[%c0_20, %c0_21] : memref<2x1xf32, #tpu.memory_space<vmem>>, vector<2x1xf32>
      %29 = arith.addf %27, %28 : vector<2x1xf32>
      %30 = vector.shape_cast %29 : vector<2x1xf32> to vector<1x2x1xf32>
      %c0_22 = arith.constant 0 : index
      %c0_23 = arith.constant 0 : index
      %c0_24 = arith.constant 0 : index
      %31 = vector.load %arg7[%c0_22, %c0_23, %c0_24] : memref<1x2x1xf32, #tpu.memory_space<vmem>>, vector<1x2x1xf32>
      tpu.vector_store %arg7[%c0_22, %c0_23, %c0_24], %30 {strides = array<i32>} : memref<1x2x1xf32, #tpu.memory_space<vmem>>, vector<1x2x1xf32>,
    } else {
    }
    return
  }
  func.func @transform_0(%arg0: i32, %arg1: i32) -> (i32, i32, i32) {
    %c0_i32 = arith.constant 0 : i32
    %c0_i32_0 = arith.constant 0 : i32
    return %arg0, %arg1, %c0_i32 : i32, i32, i32
  }
  func.func @transform_1(%arg0: i32, %arg1: i32) -> (i32, i32) {
    %c0_i32 = arith.constant 0 : i32
    %c0_i32_0 = arith.constant 0 : i32
    %c0_i32_1 = arith.constant 0 : i32
    return %c0_i32, %c0_i32_0 : i32, i32
  }
  func.func @transform_2(%arg0: i32, %arg1: i32) -> (i32, i32) {
    %c0_i32 = arith.constant 0 : i32
    %c0_i32_0 = arith.constant 0 : i32
    %c0_i32_1 = arith.constant 0 : i32
    return %c0_i32, %c0_i32_0 : i32, i32
  }
  func.func @transform_3(%arg0: i32, %arg1: i32) -> (i32, i32) {
    %c0_i32 = arith.constant 0 : i32
    %c0_i32_0 = arith.constant 0 : i32
    %c0_i32_1 = arith.constant 0 : i32
    return %c0_i32, %c0_i32_0 : i32, i32
  }
  func.func @transform_4(%arg0: i32, %arg1: i32) -> (i32, i32) {
    %c0_i32 = arith.constant 0 : i32
    %c0_i32_0 = arith.constant 0 : i32
    %c0_i32_1 = arith.constant 0 : i32
    return %c0_i32, %c0_i32_0 : i32, i32
  }
  func.func @transform_5(%arg0: i32, %arg1: i32) -> (i32, i32, i32) {
    %c0_i32 = arith.constant 0 : i32
    %c0_i32_0 = arith.constant 0 : i32
    %c0_i32_1 = arith.constant 0 : i32
    return %arg0, %c0_i32, %c0_i32_0 : i32, i32, i32
  }
}

</mosaic_0001>

<bundles_post_ra>
// kernel: _lambda_.1
= control target key start
LH: loop header
LB: loop body
LE: loop exit
PB: predicated region body
PF: predicated region fallthrough
CT: control target
= control target key end

     0   :  { %s1404_s18 = smov 0   ;;  %s1406_s19 = smov 0   ;;  %s1785_s0 = inlined_call_operand.vmem [shape: bf16[2,1024,36], index: 0, kind: input, shape index: {}]   ;;  %s1786_s1 = inlined_call_operand.vmem [shape: bf16[36,24], index: 1, kind: input, shape index: {}]   ;;  %s1787_s2 = inlined_call_operand.vmem [shape: f32[1,24], index: 2, kind: input, shape index: {}]   ;;  %s1788_s3 = inlined_call_operand.vmem [shape: f32[2,24], index: 3, kind: input, shape index: {}]   ;;  %s1789_s4 = inlined_call_operand.vmem [shape: f32[2,1], index: 4, kind: input, shape index: {}]   ;;  %s1790_s5 = inlined_call_operand.vmem [shape: f32[2,2,1], index: 5, kind: output, shape index: {}]  }
   0x1   :  { %s1408_s20 = smov 0   ;;  %s1410_s21 = smov 0  }
   0x2   :  { %s1412_s22 = smov 0  }
   0x3 LB: > { %s24_s23 = sadd.s32 1, %s1363_s20  ;;  %s27_s24 = sadd.s32 1, %s1367_s21  ;;  %s1371_s22 = sphi %s1412_s22, %s15_s22   ;;  %s1367_s21 = sphi %s1410_s21, %s1794_s21   ;;  %s1363_s20 = sphi %s1408_s20, %s1793_s20   ;;  %s1359_s19 = sphi %s1406_s19, %s1792_s19   ;;  %s1355_s18 = sphi %s1404_s18, %s1791_s18  }
   0x4   : > { %p25_p0 = scmp.ge.s32.totalorder %s24_s23, 2  ;;  %p1071_p1 = scmp.ge.s32.totalorder %s1371_s22, 1 }
   0x5   : > { %p206_p2 = scmp.lt.s32.totalorder %s1371_s22, 5 }
   0x6   : > { %s1796_s23 = smov (%p25_p0, %s24_s23), 0  ;;  %s1798_s24 = smov (!%p25_p0, %s27_s24), %s1367_s21 }
   0x7   : > { %p207_p3 = pnand %p1071_p1, %p206_p2  ;;  %p29_p4 = scmp.ge.s32.totalorder %s1798_s24, 2 }
   0x8   : > { %s1072_s25 = sshll.u32 (!%p207_p3), %s1355_s18, 6  ;;  %p238_p5 = scmp.lt.s32.totalorder (!%p207_p3), %s1359_s19, 1 }
   0x9   : > { %s1800_s24 = smov (%p29_p4, %s1798_s24), 0  ;;  %210 = sbr.rel (%p207_p3) target bundleno = 538 (0x21a), region = 40 }
   0xa   : > { %p240_p6 = scmp.lt.s32.totalorder (!%p207_p3), %s1072_s25, 127  ;;  %p1076_p7 = scmp.ne.s32.totalorder (!%p207_p3), %s1355_s18, 0 }
   0xe   : > { %s1802_s19 = smov (!%p238_p5, %s1359_s19), 1  ;;  %s1804_s25 = smov (!%p240_p6, %s1072_s25), 127 }
   0xf   : > { %s1073_s26 = sshll.u32 %s1802_s19, 7  ;;  %s1075_s27 = sshll.u32 %s1802_s19, 1 }
  0x10   : > { %s243_s28 = sadd.s32 %s1073_s26, %s1804_s25  ;;  %s1440_s6 = scalar_lea.vmem %s1790_s5, %s1075_s27 }
  0x11   : > { %s1074_s7 = sshll.u32 %s243_s28, 2  ;;  %255 = sbr.rel (%p1076_p7) target bundleno = 24 (0x18), region = 44 }
  0x12   : > { %s1445_s10 = scalar_lea.vmem %s1785_s0, %s1074_s7 }
  0x16   : > { %vm256_vm0 = vcmask 188416   ;;  %v1373_v0 = vmov 0.0  }
  0x17   : > { %257 = vst.msk [vmem:[#allocation2] sm:$0x1] %vm256_vm0, %v1373_v0 }
  0x18 PF: > { %v326_v1 = vld [vmem:[%s1786_s1 + $0x10] sm:$0x3]  ;;  %vm603_vm1 = vcmask 1041408   ;;  %v1281_v5 = vld [vmem:[%s1786_s1 + $0x8] sm:$0xff]  ;;  %v1280_v6 = vld [vmem:[%s1786_s1] sm:$0xff]  ;;  %vm506_vm2 = vcmask 293888  }
  0x19   : > { %v500_v2 = vunpack.c.l.b16 %v326_v1  ;;  %v1248_v7 = vld [vmem:[%s1445_s10] sm:$0xff]  ;;  %v1249_v9 = vld [vmem:[%s1445_s10 + $0x8] sm:$0xff]  ;;  %v1250_v12 = vld [vmem:[%s1445_s10 + $0x10] sm:$0xff]  ;;  %vm841_vm3 = vcmask 195584   ;;  %vm976_vm4 = vcmask 188416   ;;  %p1245_p8 = scmp.ne.s32.totalorder %s1355_s18, 1 }
  0x1a   : > { %v1256_v8 = vld [vmem:[%s1445_s10 + $0x40] sm:$0xff]  ;;  %v1257_v10 = vld [vmem:[%s1445_s10 + $0x48] sm:$0xff]  ;;  %v1258_v13 = vld [vmem:[%s1445_s10 + $0x50] sm:$0xff] }
  0x1b   : > { %v503_v3 = vpack.c.b16 %v500_v2, %v500_v2  ;;  %v1264_v11 = vld [vmem:[%s1445_s10 + $0x80] sm:$0xff]  ;;  %v1265_v14 = vld [vmem:[%s1445_s10 + $0x88] sm:$0xff]  ;;  %v1251_v15 = vld [vmem:[%s1445_s10 + $0x18] sm:$0xff] }
  0x1c   : > { %v1259_v16 = vld [vmem:[%s1445_s10 + $0x58] sm:$0xff]  ;;  %v1266_v17 = vld [vmem:[%s1445_s10 + $0x90] sm:$0xff]  ;;  %v1272_v18 = vld [vmem:[%s1445_s10 + $0xc0] sm:$0xff] }
  0x1d   : > { %v605_v4 = vsel %vm603_vm1, %v503_v3, 0  ;;  %v1252_v19 = vld [vmem:[%s1445_s10 + $0x20] sm:$0xff]  ;;  %v1267_v21 = vld [vmem:[%s1445_s10 + $0x98] sm:$0xff]  ;;  %v1273_v22 = vld [vmem:[%s1445_s10 + $0xc8] sm:$0xff] }
  0x1e   : > { %612 = vmatpush.bf16.msra.mxu0 %v605_v4  ;;  %1282 = vmatpush.bf16.msra.mxu1 %v605_v4  ;;  %v1260_v20 = vld [vmem:[%s1445_s10 + $0x60] sm:$0xff]  ;;  %v1253_v23 = vld [vmem:[%s1445_s10 + $0x28] sm:$0xff]  ;;  %v1274_v26 = vld [vmem:[%s1445_s10 + $0xd0] sm:$0xff] }
  0x1f   : > { %1283 = vmatpush.bf16.msra.mxu2 %v605_v4  ;;  %1284 = vmatpush.bf16.msra.mxu3 %v605_v4  ;;  %v1261_v24 = vld [vmem:[%s1445_s10 + $0x68] sm:$0xff]  ;;  %v1268_v25 = vld [vmem:[%s1445_s10 + $0xa0] sm:$0xff]  ;;  %v1254_v27 = vld [vmem:[%s1445_s10 + $0x30] sm:$0xff] }
  0x20   : > { %v1262_v28 = vld [vmem:[%s1445_s10 + $0x70] sm:$0xff]  ;;  %v1269_v29 = vld [vmem:[%s1445_s10 + $0xa8] sm:$0xff]  ;;  %v1275_v30 = vld [vmem:[%s1445_s10 + $0xd8] sm:$0xff] }
  0x21   : > { %v1255_v31 = vld [vmem:[%s1445_s10 + $0x38] sm:$0xff]  ;;  %v1270_v33 = vld [vmem:[%s1445_s10 + $0xb0] sm:$0xff]  ;;  %v1276_v34 = vld [vmem:[%s1445_s10 + $0xe0] sm:$0xff] }
  0x22   : > { %613 = vmatpush.bf16.msra.mxu0 %v1281_v5  ;;  %1285 = vmatpush.bf16.msra.mxu1 %v1281_v5  ;;  %v1263_v32 = vld [vmem:[%s1445_s10 + $0x78] sm:$0xff]  ;;  %v1518_v37 = vld [vmem:[%s1787_s2] ss:$0 sm:$0xff]  ;;  %v1277_v39 = vld [vmem:[%s1445_s10 + $0xe8] sm:$0xff] }
  0x23   : > { %1286 = vmatpush.bf16.msra.mxu2 %v1281_v5  ;;  %1287 = vmatpush.bf16.msra.mxu3 %v1281_v5  ;;  %v1271_v38 = vld [vmem:[%s1445_s10 + $0xb8] sm:$0xff]  ;;  %v1278_v53 = vld [vmem:[%s1445_s10 + $0xf0] sm:$0xff] }
  0x24   : > { %v1279_v2 = vld [vmem:[%s1445_s10 + $0xf8] sm:$0xff] }
  0x26   : > { %614 = vmatpush.bf16.msra.mxu0 %v1280_v6  ;;  %1288 = vmatpush.bf16.msra.mxu1 %v1280_v6 }
  0x27   : > { %1289 = vmatpush.bf16.msra.mxu2 %v1280_v6  ;;  %1290 = vmatpush.bf16.msra.mxu3 %v1280_v6 }
  0x29   : > { %1213 = vmatmul.msk.bf16.vlgmr.msra.gmra.mxu0 %vm506_vm2, %v1248_v7  ;;  %1221 = vmatmul.msk.bf16.vlgmr.msra.gmra.mxu1 %vm506_vm2, %v1256_v8 }
  0x2a   : > { %1229 = vmatmul.msk.bf16.vlgmr.msra.gmra.mxu2 %vm506_vm2, %v1264_v11  ;;  %1237 = vmatmul.msk.bf16.vlgmr.msra.gmra.mxu3 %vm506_vm2, %v1272_v18 }
  0x39   : > { %1214 = vmatmul.msk.bf16.gmra.mxu0 %vm506_vm2, %v1249_v9  ;;  %1222 = vmatmul.msk.bf16.gmra.mxu1 %vm506_vm2, %v1257_v10 }
  0x3a   : > { %1230 = vmatmul.msk.bf16.gmra.mxu2 %vm506_vm2, %v1265_v14  ;;  %1238 = vmatmul.msk.bf16.gmra.mxu3 %vm506_vm2, %v1273_v22 }
  0x49   : > { %1215 = vmatmul.msk.bf16.gmra.mxu0 %vm506_vm2, %v1250_v12  ;;  %1223 = vmatmul.msk.bf16.gmra.mxu1 %vm506_vm2, %v1258_v13 }
  0x4a   : > { %1231 = vmatmul.msk.bf16.gmra.mxu2 %vm506_vm2, %v1266_v17  ;;  %1239 = vmatmul.msk.bf16.gmra.mxu3 %vm506_vm2, %v1274_v26 }
  0x59   : > { %1216 = vmatmul.msk.bf16.gmra.mxu0 %vm506_vm2, %v1251_v15  ;;  %1224 = vmatmul.msk.bf16.gmra.mxu1 %vm506_vm2, %v1259_v16 }
  0x5a   : > { %1232 = vmatmul.msk.bf16.gmra.mxu2 %vm506_vm2, %v1267_v21  ;;  %1240 = vmatmul.msk.bf16.gmra.mxu3 %vm506_vm2, %v1275_v30 }
  0x69   : > { %1217 = vmatmul.msk.bf16.gmra.mxu0 %vm506_vm2, %v1252_v19  ;;  %1225 = vmatmul.msk.bf16.gmra.mxu1 %vm506_vm2, %v1260_v20 }
  0x6a   : > { %1233 = vmatmul.msk.bf16.gmra.mxu2 %vm506_vm2, %v1268_v25  ;;  %1241 = vmatmul.msk.bf16.gmra.mxu3 %vm506_vm2, %v1276_v34 }
  0x79   : > { %1218 = vmatmul.msk.bf16.gmra.mxu0 %vm506_vm2, %v1253_v23  ;;  %1226 = vmatmul.msk.bf16.gmra.mxu1 %vm506_vm2, %v1261_v24 }
  0x7a   : > { %1234 = vmatmul.msk.bf16.gmra.mxu2 %vm506_vm2, %v1269_v29  ;;  %1242 = vmatmul.msk.bf16.gmra.mxu3 %vm506_vm2, %v1277_v39 }
  0x89   : > { %1219 = vmatmul.msk.bf16.gmra.mxu0 %vm506_vm2, %v1254_v27  ;;  %1227 = vmatmul.msk.bf16.gmra.mxu1 %vm506_vm2, %v1262_v28 }
  0x8a   : > { %1235 = vmatmul.msk.bf16.gmra.mxu2 %vm506_vm2, %v1270_v33  ;;  %1243 = vmatmul.msk.bf16.gmra.mxu3 %vm506_vm2, %v1278_v53 }
  0x99   : > { %1220 = vmatmul.msk.bf16.gmra.mxu0 %vm506_vm2, %v1255_v31  ;;  %1228 = vmatmul.msk.bf16.gmra.mxu1 %vm506_vm2, %v1263_v32 }
  0x9a   : > { %1236 = vmatmul.msk.bf16.gmra.mxu2 %vm506_vm2, %v1271_v38  ;;  %1244 = vmatmul.msk.bf16.gmra.mxu3 %vm506_vm2, %v1279_v2 }
  0xa6   : > { %v616_v35 = vpop.f32.mrf.mxu0  ;;  %v1513_v36 = vpop.f32.mrf.mxu1 }
  0xa7   : > { %v617_v40 = vadd.f32 %v1518_v37, %v616_v35 }
  0xa9   : > { %v776_v43 = vmax.f32 %v617_v40, 0.0 }
  0xab   : > { %v842_v46 = vsel %vm841_vm3, %v776_v43, 0.0 }
  0xad   : > { %v1539_v60 = vpop.f32.mrf.mxu2  ;;  %v1558_v14 = vpop.f32.mrf.mxu3 }
  0xae   : > { %v618_v41 = vpop.f32.mrf.mxu0  ;;  %v1525_v42 = vpop.f32.mrf.mxu1 }
  0xaf   : > { %v619_v44 = vadd.f32 %v1518_v37, %v618_v41 }
  0xb1   : > { %v777_v45 = vmax.f32 %v619_v44, 0.0 }
  0xb3   : > { %v843_v47 = vsel %vm841_vm3, %v777_v45, 0.0 }
  0xb4   : > { %v844_v48 = vadd.f32 %v843_v47, %v842_v46 }
  0xb5   : > { %v1548_v6 = vpop.f32.mrf.mxu2  ;;  %v1564_v18 = vpop.f32.mrf.mxu3 }
  0xb6   : > { %v621_v49 = vpop.f32.mrf.mxu0  ;;  %v1530_v50 = vpop.f32.mrf.mxu1 }
  0xb7   : > { %v622_v51 = vadd.f32 %v1518_v37, %v621_v49 }
  0xb9   : > { %v778_v52 = vmax.f32 %v622_v51, 0.0 }
  0xbb   : > { %v845_v54 = vsel %vm841_vm3, %v778_v52, 0.0 }
  0xbc   : > { %v846_v55 = vadd.f32 %v845_v54, %v844_v48 }
  0xbd   : > { %v1552_v10 = vpop.f32.mrf.mxu2  ;;  %v1570_v23 = vpop.f32.mrf.mxu3 }
  0xbe   : > { %v623_v56 = vpop.f32.mrf.mxu0  ;;  %v1537_v58 = vpop.f32.mrf.mxu1 }
  0xbf   : > { %v624_v57 = vadd.f32 %v1518_v37, %v623_v56 }
  0xc1   : > { %v779_v59 = vmax.f32 %v624_v57, 0.0 }
  0xc3   : > { %v847_v61 = vsel %vm841_vm3, %v779_v59, 0.0 }
  0xc4   : > { %v848_v62 = vadd.f32 %v847_v61, %v846_v55 }
  0xc5   : > { %v1556_v13 = vpop.f32.mrf.mxu2  ;;  %v1576_v27 = vpop.f32.mrf.mxu3 }
  0xc6   : > { %v626_v63 = vpop.f32.mrf.mxu0  ;;  %v1544_v3 = vpop.f32.mrf.mxu1 }
  0xc7   : > { %v627_v0 = vadd.f32 %v1518_v37, %v626_v63 }
  0xc9   : > { %v780_v1 = vmax.f32 %v627_v0, 0.0 }
  0xcb   : > { %v849_v4 = vsel %vm841_vm3, %v780_v1, 0.0 }
  0xcc   : > { %v850_v5 = vadd.f32 %v849_v4, %v848_v62 }
  0xcd   : > { %v1562_v17 = vpop.f32.mrf.mxu2  ;;  %v1585_v35 = vpop.f32.mrf.mxu3 }
  0xce   : > { %v628_v7 = vpop.f32.mrf.mxu0  ;;  %v1550_v8 = vpop.f32.mrf.mxu1 }
  0xcf   : > { %v629_v28 = vadd.f32 %v1518_v37, %v628_v7 }
  0xd1   : > { %v781_v33 = vmax.f32 %v629_v28, 0.0 }
  0xd3   : > { %v851_v40 = vsel %vm841_vm3, %v781_v33, 0.0 }
  0xd4   : > { %v852_v48 = vadd.f32 %v851_v40, %v850_v5 }
  0xd5   : > { %v1568_v21 = vpop.f32.mrf.mxu2  ;;  %v1600_v62 = vpop.f32.mrf.mxu3 }
  0xd6   : > { %v631_v9 = vpop.f32.mrf.mxu0  ;;  %v1554_v12 = vpop.f32.mrf.mxu1 }
  0xd7   : > { %v632_v31 = vadd.f32 %v1518_v37, %v631_v9 }
  0xd9   : > { %v782_v38 = vmax.f32 %v632_v31, 0.0 }
  0xdb   : > { %v853_v45 = vsel %vm841_vm3, %v782_v38, 0.0 }
  0xdc   : > { %v854_v54 = vadd.f32 %v853_v45, %v852_v48  ;;  %v662_v48 = vadd.f32 %v1518_v37, %v1530_v50 }
  0xdd   : > { %v1574_v26 = vpop.f32.mrf.mxu2 }
  0xde   : > { %v633_v11 = vpop.f32.mrf.mxu0  ;;  %v1560_v16 = vpop.f32.mrf.mxu1 }
  0xdf   : > { %v634_v34 = vadd.f32 %v1518_v37, %v633_v11 }
  0xe1   : > { %v783_v41 = vmax.f32 %v634_v34, 0.0  ;;  %v657_v34 = vadd.f32 %v1518_v37, %v1513_v36 }
  0xe3   : > { %v855_v51 = vsel %vm841_vm3, %v783_v41, 0.0  ;;  %v1613_v41 = vpop.f32.mrf.mxu3 }
  0xe4   : > { %v856_v61 = vadd.f32 %v855_v51, %v854_v54 }
  0xe5   : > { %v1582_v32 = vpop.f32.mrf.mxu2 }
  0xe6   : > { %v636_v15 = vpop.f32.mrf.mxu0  ;;  %v1566_v20 = vpop.f32.mrf.mxu1 }
  0xe7   : > { %v637_v39 = vadd.f32 %v1518_v37, %v636_v15 }
  0xe9   : > { %v784_v46 = vmax.f32 %v637_v39, 0.0 }
  0xeb   : > { %v857_v56 = vsel %vm841_vm3, %v784_v46, 0.0 }
  0xec   : > { %v858_v2 = vadd.f32 %v857_v56, %v856_v61  ;;  %v667_v61 = vadd.f32 %v1518_v37, %v1544_v3 }
  0xed   : > { %v1596_v55 = vpop.f32.mrf.mxu2 }
  0xee   : > { %v638_v19 = vpop.f32.mrf.mxu0  ;;  %v1572_v24 = vpop.f32.mrf.mxu1 }
  0xef   : > { %v639_v43 = vadd.f32 %v1518_v37, %v638_v19 }
  0xf1   : > { %v785_v52 = vmax.f32 %v639_v43, 0.0  ;;  %v659_v43 = vadd.f32 %v1518_v37, %v1525_v42 }
  0xf3   : > { %v859_v63 = vsel %vm841_vm3, %v785_v52, 0.0  ;;  %v793_v52 = vmax.f32 %v659_v43, 0.0 }
  0xf4   : > { %v860_v11 = vadd.f32 %v859_v63, %v858_v2  ;;  %v669_v2 = vadd.f32 %v1518_v37, %v1550_v8 }
  0xf5   : > { %v1608_v33 = vpop.f32.mrf.mxu2  ;;  %v875_v50 = vsel %vm841_vm3, %v793_v52, 0.0 }
  0xf6   : > { %v641_v22 = vpop.f32.mrf.mxu0  ;;  %v1579_v30 = vpop.f32.mrf.mxu1 }
  0xf7   : > { %v642_v47 = vadd.f32 %v1518_v37, %v641_v22 }
  0xf9   : > { %v786_v57 = vmax.f32 %v642_v47, 0.0  ;;  %v792_v47 = vmax.f32 %v657_v34, 0.0 }
  0xfb   : > { %v861_v5 = vsel %vm841_vm3, %v786_v57, 0.0  ;;  %v873_v42 = vsel %vm841_vm3, %v792_v47, 0.0 }
  0xfc   : > { %v862_v22 = vadd.f32 %v861_v5, %v860_v11 }
  0xfe   : > { %v643_v25 = vpop.f32.mrf.mxu0  ;;  %v1592_v49 = vpop.f32.mrf.mxu1 }
  0xff   : > { %v644_v53 = vadd.f32 %v1518_v37, %v643_v25 }
 0x101   : > { %v787_v0 = vmax.f32 %v644_v53, 0.0  ;;  %v664_v53 = vadd.f32 %v1518_v37, %v1537_v58 }
 0x103   : > { %v863_v15 = vsel %vm841_vm3, %v787_v0, 0.0  ;;  %v1627_v0 = vpop.f32.mrf.mxu2 }
 0x104   : > { %v864_v31 = vadd.f32 %v863_v15, %v862_v22  ;;  %v797_v15 = vmax.f32 %v669_v2, 0.0 }
 0x106   : > { %v646_v29 = vpop.f32.mrf.mxu0  ;;  %v686_v25 = vpop.f32.mrf.mxu1 }
 0x107   : > { %v647_v59 = vadd.f32 %v1518_v37, %v646_v29 }
 0x109   : > { %v788_v7 = vmax.f32 %v647_v59, 0.0  ;;  %v794_v59 = vmax.f32 %v662_v48, 0.0 }
 0x10b   : > { %v865_v28 = vsel %vm841_vm3, %v788_v7, 0.0  ;;  %v877_v5 = vsel %vm841_vm3, %v794_v59, 0.0  ;;  %v796_v7 = vmax.f32 %v667_v61, 0.0  ;;  %v1646_v43 = vpop.f32.mrf.mxu2 }
 0x10c   : > { %v866_v39 = vadd.f32 %v865_v28, %v864_v31 }
 0x10d   : > { %v881_v28 = vsel %vm841_vm3, %v796_v7, 0.0 }
 0x10e   : > { %v648_v44 = vpop.f32.mrf.mxu0  ;;  %v688_v57 = vpop.f32.mrf.mxu1 }
 0x10f   : > { %v649_v1 = vadd.f32 %v1518_v37, %v648_v44 }
 0x111   : > { %v789_v19 = vmax.f32 %v649_v1, 0.0  ;;  %v795_v1 = vmax.f32 %v664_v53, 0.0  ;;  %v687_v53 = vadd.f32 %v1518_v37, %v686_v25 }
 0x113   : > { %v867_v38 = vsel %vm841_vm3, %v789_v19, 0.0  ;;  %v879_v3 = vsel %vm841_vm3, %v795_v1, 0.0  ;;  %v674_v19 = vadd.f32 %v1518_v37, %v1560_v16  ;;  %v726_v2 = vpop.f32.mrf.mxu2 }
 0x114   : > { %v868_v46 = vadd.f32 %v867_v38, %v866_v39  ;;  %v883_v38 = vsel %vm841_vm3, %v797_v15, 0.0 }
 0x115   : > { %v799_v39 = vmax.f32 %v674_v19, 0.0  ;;  %v699_v19 = vadd.f32 %v1518_v37, %v1548_v6 }
 0x116   : > { %v651_v4 = vpop.f32.mrf.mxu0  ;;  %v691_v34 = vpop.f32.mrf.mxu1 }
 0x117   : > { %v652_v9 = vadd.f32 %v1518_v37, %v651_v4  ;;  %v1632_v4 = vpop.f32.mrf.mxu3  ;;  %v692_v1 = vadd.f32 %v1518_v37, %v691_v34 }
 0x119   : > { %v790_v29 = vmax.f32 %v652_v9, 0.0  ;;  %v672_v9 = vadd.f32 %v1518_v37, %v1554_v12  ;;  %v679_v12 = vadd.f32 %v1518_v37, %v1572_v24 }
 0x11b   : > { %v869_v44 = vsel %vm841_vm3, %v790_v29, 0.0  ;;  %v798_v8 = vmax.f32 %v672_v9, 0.0  ;;  %v677_v29 = vadd.f32 %v1518_v37, %v1566_v20  ;;  %v887_v20 = vsel %vm841_vm3, %v799_v39, 0.0 }
 0x11c   : > { %v870_v36 = vadd.f32 %v869_v44, %v868_v46  ;;  %v801_v48 = vmax.f32 %v679_v12, 0.0  ;;  %v809_v39 = vmax.f32 %v699_v19, 0.0  ;;  %v727_v19 = vadd.f32 %v1518_v37, %v726_v2 }
 0x11d   : > { %v885_v16 = vsel %vm841_vm3, %v798_v8, 0.0  ;;  %v800_v44 = vmax.f32 %v677_v29, 0.0 }
 0x11e   : > { %v653_v40 = vpop.f32.mrf.mxu0  ;;  %v693_v61 = vpop.f32.mrf.mxu1 }
 0x11f   : > { %v654_v45 = vadd.f32 %v1518_v37, %v653_v40  ;;  %v1651_v47 = vpop.f32.mrf.mxu3  ;;  %v889_v24 = vsel %vm841_vm3, %v800_v44, 0.0  ;;  %v694_v25 = vadd.f32 %v1518_v37, %v693_v61 }
 0x121   : > { %v791_v51 = vmax.f32 %v654_v45, 0.0  ;;  %v682_v45 = vadd.f32 %v1518_v37, %v1579_v30  ;;  %v689_v30 = vadd.f32 %v1518_v37, %v688_v57  ;;  %v697_v57 = vadd.f32 %v1518_v37, %v1539_v60 }
 0x122   : > { %v704_v60 = vadd.f32 %v1518_v37, %v1556_v13 }
 0x123   : > { %v871_v54 = vsel %vm841_vm3, %v791_v51, 0.0  ;;  %v684_v51 = vadd.f32 %v1518_v37, %v1592_v49  ;;  %v802_v52 = vmax.f32 %v682_v45, 0.0  ;;  %v808_v29 = vmax.f32 %v697_v57, 0.0 }
 0x124   : > { %v872_v56 = vadd.f32 %v871_v54, %v870_v36  ;;  %v707_v45 = vadd.f32 %v1518_v37, %v1562_v17 }
 0x125   : > { %v905_v6 = vsel %vm841_vm3, %v808_v29, 0.0 }
 0x126   : > { %v874_v63 = vadd.f32 %v873_v42, %v872_v56  ;;  %v891_v56 = vsel %vm841_vm3, %v801_v48, 0.0  ;;  %v803_v42 = vmax.f32 %v684_v51, 0.0  ;;  %v811_v48 = vmax.f32 %v704_v60, 0.0 }
 0x127   : > { %v1664_v9 = vpop.f32.mrf.mxu3  ;;  %v709_v51 = vadd.f32 %v1518_v37, %v1568_v21  ;;  %v717_v21 = vadd.f32 %v1518_v37, %v1596_v55 }
 0x128   : > { %v876_v58 = vadd.f32 %v875_v50, %v874_v63  ;;  %v893_v63 = vsel %vm841_vm3, %v802_v52, 0.0  ;;  %v804_v50 = vmax.f32 %v687_v53, 0.0  ;;  %v712_v52 = vadd.f32 %v1518_v37, %v1574_v26 }
 0x129   : > { %v813_v17 = vmax.f32 %v709_v51, 0.0  ;;  %v719_v26 = vadd.f32 %v1518_v37, %v1608_v33 }
 0x12a   : > { %v878_v11 = vadd.f32 %v877_v5, %v876_v58  ;;  %v895_v58 = vsel %vm841_vm3, %v803_v42, 0.0  ;;  %v805_v5 = vmax.f32 %v689_v30, 0.0 }
 0x12b   : > { %v817_v57 = vmax.f32 %v719_v26, 0.0  ;;  %v752_v26 = vadd.f32 %v1518_v37, %v1613_v41  ;;  %v759_v41 = vadd.f32 %v1518_v37, %v1664_v9 }
 0x12c   : > { %v880_v22 = vadd.f32 %v879_v3, %v878_v11  ;;  %v897_v11 = vsel %vm841_vm3, %v804_v50, 0.0  ;;  %v806_v3 = vmax.f32 %v692_v1, 0.0  ;;  %v915_v50 = vsel %vm841_vm3, %v813_v17, 0.0 }
 0x12e   : > { %v882_v31 = vadd.f32 %v881_v28, %v880_v22  ;;  %v899_v22 = vsel %vm841_vm3, %v805_v5, 0.0  ;;  %v807_v28 = vmax.f32 %v694_v25, 0.0  ;;  %v901_v34 = vsel %vm841_vm3, %v806_v3, 0.0 }
 0x12f   : > { %v816_v5 = vmax.f32 %v717_v21, 0.0  ;;  %v722_v25 = vadd.f32 %v1518_v37, %v1627_v0 }
 0x130   : > { %v884_v40 = vadd.f32 %v883_v38, %v882_v31  ;;  %v702_v31 = vadd.f32 %v1518_v37, %v1552_v10  ;;  %v903_v12 = vsel %vm841_vm3, %v807_v28, 0.0  ;;  %v907_v10 = vsel %vm841_vm3, %v809_v39, 0.0 }
 0x131   : > { %v818_v33 = vmax.f32 %v722_v25, 0.0  ;;  %v923_v28 = vsel %vm841_vm3, %v817_v57, 0.0 }
 0x132   : > { %v886_v46 = vadd.f32 %v885_v16, %v884_v40  ;;  %v728_v16 = vpop.f32.mrf.mxu2  ;;  %v810_v44 = vmax.f32 %v702_v31, 0.0 }
 0x133   : > { %v729_v29 = vadd.f32 %v1518_v37, %v728_v16 }
 0x134   : > { %v888_v36 = vadd.f32 %v887_v20, %v886_v46  ;;  %v1681_v20 = vpop.f32.mrf.mxu3 }
 0x136   : > { %v890_v54 = vadd.f32 %v889_v24, %v888_v36  ;;  %v909_v36 = vsel %vm841_vm3, %v810_v44, 0.0  ;;  %v812_v24 = vmax.f32 %v707_v45, 0.0  ;;  %v737_v44 = vadd.f32 %v1518_v37, %v1558_v14 }
 0x137   : > { %v744_v14 = vadd.f32 %v1518_v37, %v1576_v27 }
 0x138   : > { %v892_v59 = vadd.f32 %v891_v56, %v890_v54  ;;  %v911_v54 = vsel %vm841_vm3, %v811_v48, 0.0  ;;  %v714_v56 = vadd.f32 %v1518_v37, %v1582_v32  ;;  %v913_v30 = vsel %vm841_vm3, %v812_v24, 0.0 }
 0x139   : > { %v742_v24 = vadd.f32 %v1518_v37, %v1570_v23 }
 0x13a   : > { %v894_v49 = vadd.f32 %v893_v63, %v892_v59  ;;  %v814_v59 = vmax.f32 %v712_v52, 0.0  ;;  %v731_v63 = vpop.f32.mrf.mxu2  ;;  %v815_v1 = vmax.f32 %v714_v56, 0.0 }
 0x13b   : > { %v732_v39 = vadd.f32 %v1518_v37, %v731_v63  ;;  %v749_v63 = vadd.f32 %v1518_v37, %v1600_v62  ;;  %v757_v62 = vadd.f32 %v1518_v37, %v1651_v47 }
 0x13c   : > { %v896_v7 = vadd.f32 %v895_v58, %v894_v49  ;;  %v1698_v58 = vpop.f32.mrf.mxu3  ;;  %v917_v32 = vsel %vm841_vm3, %v814_v59, 0.0  ;;  %v919_v55 = vsel %vm841_vm3, %v815_v1, 0.0  ;;  %v747_v59 = vadd.f32 %v1518_v37, %v1585_v35 }
 0x13d   : > { %v822_v45 = vmax.f32 %v732_v39, 0.0  ;;  %v754_v35 = vadd.f32 %v1518_v37, %v1632_v4  ;;  %v762_v4 = vadd.f32 %v1518_v37, %v1681_v20  ;;  %v764_v47 = vadd.f32 %v1518_v37, %v1698_v58 }
 0x13e   : > { %v898_v15 = vadd.f32 %v897_v11, %v896_v7  ;;  %v724_v11 = vadd.f32 %v1518_v37, %v1646_v43  ;;  %v828_v1 = vmax.f32 %v747_v59, 0.0 }
 0x13f   : > { %v933_v52 = vsel %vm841_vm3, %v822_v45, 0.0 }
 0x140   : > { %v900_v8 = vadd.f32 %v899_v22, %v898_v15  ;;  %v921_v15 = vsel %vm841_vm3, %v816_v5, 0.0  ;;  %v829_v5 = vmax.f32 %v749_v63, 0.0 }
 0x142   : > { %v902_v38 = vadd.f32 %v901_v34, %v900_v8  ;;  %v819_v8 = vmax.f32 %v724_v11, 0.0  ;;  %v733_v31 = vpop.f32.mrf.mxu2  ;;  %v925_v34 = vsel %vm841_vm3, %v818_v33, 0.0 }
 0x143   : > { %v734_v2 = vadd.f32 %v1518_v37, %v733_v31 }
 0x144   : > { %v904_v40 = vadd.f32 %v903_v12, %v902_v38  ;;  %v820_v38 = vmax.f32 %v727_v19, 0.0  ;;  %v766_v60 = vpop.f32.mrf.mxu3  ;;  %v927_v12 = vsel %vm841_vm3, %v819_v8, 0.0 }
 0x145   : > { %v823_v51 = vmax.f32 %v734_v2, 0.0  ;;  %v767_v9 = vadd.f32 %v1518_v37, %v766_v60 }
 0x146   : > { %v906_v46 = vadd.f32 %v905_v6, %v904_v40  ;;  %v821_v40 = vmax.f32 %v729_v29, 0.0  ;;  %v929_v16 = vsel %vm841_vm3, %v820_v38, 0.0  ;;  %v833_v29 = vmax.f32 %v759_v41, 0.0 }
 0x147   : > { %v935_v17 = vsel %vm841_vm3, %v823_v51, 0.0 }
 0x148   : > { %v908_v13 = vadd.f32 %v907_v10, %v906_v46  ;;  %v739_v10 = vadd.f32 %v1518_v37, %v1564_v18  ;;  %v931_v48 = vsel %vm841_vm3, %v821_v40, 0.0  ;;  %v955_v39 = vsel %vm841_vm3, %v833_v29, 0.0 }
 0x14a   : > { %v910_v53 = vadd.f32 %v909_v36, %v908_v13  ;;  %v824_v36 = vmax.f32 %v737_v44, 0.0 }
 0x14c   : > { %v912_v42 = vadd.f32 %v911_v54, %v910_v53  ;;  %v825_v54 = vmax.f32 %v739_v10, 0.0  ;;  %v937_v18 = vsel %vm841_vm3, %v824_v36, 0.0 }
 0x14e   : > { %v914_v61 = vadd.f32 %v913_v30, %v912_v42  ;;  %v768_v42 = vpop.f32.mrf.mxu3  ;;  %v826_v30 = vmax.f32 %v742_v24, 0.0  ;;  %v939_v23 = vsel %vm841_vm3, %v825_v54, 0.0 }
 0x150   : > { %v916_v49 = vadd.f32 %v915_v50, %v914_v61  ;;  %v827_v61 = vmax.f32 %v744_v14, 0.0  ;;  %v941_v27 = vsel %vm841_vm3, %v826_v30, 0.0  ;;  %v840_v30 = vld [vmem:[#allocation2] sm:$0x1] }
 0x152   : > { %v918_v7 = vadd.f32 %v917_v32, %v916_v49  ;;  %v943_v32 = vsel %vm841_vm3, %v827_v61, 0.0 }
 0x154   : > { %v920_v3 = vadd.f32 %v919_v55, %v918_v7  ;;  %v945_v7 = vsel %vm841_vm3, %v828_v1, 0.0  ;;  %v830_v55 = vmax.f32 %v752_v26, 0.0 }
 0x156   : > { %v922_v22 = vadd.f32 %v921_v15, %v920_v3  ;;  %v771_v11 = vpop.f32.mrf.mxu3  ;;  %v947_v3 = vsel %vm841_vm3, %v829_v5, 0.0  ;;  %v831_v15 = vmax.f32 %v754_v35, 0.0  ;;  %v949_v19 = vsel %vm841_vm3, %v830_v55, 0.0 }
 0x157   : > { %v772_v44 = vadd.f32 %v1518_v37, %v771_v11 }
 0x158   : > { %v924_v0 = vadd.f32 %v923_v28, %v922_v22  ;;  %v832_v22 = vmax.f32 %v757_v62, 0.0  ;;  %v951_v8 = vsel %vm841_vm3, %v831_v15, 0.0 }
 0x15a   : > { %v926_v43 = vadd.f32 %v925_v34, %v924_v0  ;;  %v953_v31 = vsel %vm841_vm3, %v832_v22, 0.0  ;;  %v834_v34 = vmax.f32 %v762_v4, 0.0 }
 0x15c   : > { %v928_v6 = vadd.f32 %v927_v12, %v926_v43  ;;  %v835_v43 = vmax.f32 %v764_v47, 0.0  ;;  %v769_v12 = vadd.f32 %v1518_v37, %v768_v42  ;;  %v957_v2 = vsel %vm841_vm3, %v834_v34, 0.0 }
 0x15e   : > { %v930_v46 = vadd.f32 %v929_v16, %v928_v6  ;;  %v773_v40 = vpop.f32.mrf.mxu3  ;;  %v836_v6 = vmax.f32 %v767_v9, 0.0  ;;  %v959_v16 = vsel %vm841_vm3, %v835_v43, 0.0  ;;  %v837_v45 = vmax.f32 %v769_v12, 0.0 }
 0x160   : > { %v932_v13 = vadd.f32 %v931_v48, %v930_v46  ;;  %v774_v46 = vadd.f32 %v1518_v37, %v773_v40  ;;  %v961_v10 = vsel %vm841_vm3, %v836_v6, 0.0  ;;  %v838_v48 = vmax.f32 %v772_v44, 0.0 }
 0x162   : > { %v934_v53 = vadd.f32 %v933_v52, %v932_v13  ;;  %v963_v13 = vsel %vm841_vm3, %v837_v45, 0.0  ;;  %v839_v36 = vmax.f32 %v774_v46, 0.0  ;;  %v965_v52 = vsel %vm841_vm3, %v838_v48, 0.0 }
 0x164   : > { %v936_v56 = vadd.f32 %v935_v17, %v934_v53  ;;  %v967_v54 = vsel %vm841_vm3, %v839_v36, 0.0 }
 0x166   : > { %v938_v21 = vadd.f32 %v937_v18, %v936_v56 }
 0x168   : > { %v940_v50 = vadd.f32 %v939_v23, %v938_v21 }
 0x16a   : > { %v942_v49 = vadd.f32 %v941_v27, %v940_v50 }
 0x16c   : > { %v944_v25 = vadd.f32 %v943_v32, %v942_v49 }
 0x16e   : > { %v946_v57 = vadd.f32 %v945_v7, %v944_v25 }
 0x170   : > { %v948_v33 = vadd.f32 %v947_v3, %v946_v57 }
 0x172   : > { %v950_v28 = vadd.f32 %v949_v19, %v948_v33 }
 0x174   : > { %v952_v0 = vadd.f32 %v951_v8, %v950_v28 }
 0x176   : > { %v954_v38 = vadd.f32 %v953_v31, %v952_v0 }
 0x178   : > { %v956_v20 = vadd.f32 %v955_v39, %v954_v38 }
 0x17a   : > { %v958_v58 = vadd.f32 %v957_v2, %v956_v20 }
 0x17c   : > { %v960_v60 = vadd.f32 %v959_v16, %v958_v58 }
 0x17e   : > { %v962_v51 = vadd.f32 %v961_v10, %v960_v60 }
 0x180   : > { %v964_v24 = vadd.f32 %v963_v13, %v962_v51 }
 0x182   : > { %v966_v53 = vadd.f32 %v965_v52, %v964_v24 }
 0x184   : > { %v968_v14 = vadd.f32 %v967_v54, %v966_v53 }
 0x186   : > { %v969_v17 = vrot.slane %v968_v14, 4 }
 0x188   : > { %v970_v56 = vadd.f32 %v969_v17, %v968_v14 }
 0x18a   : > { %v971_v42 = vrot.slane %v970_v56, 2 }
 0x18c   : > { %v972_v18 = vadd.f32 %v971_v42, %v970_v56 }
 0x18e   : > { %v973_v37 = vrot.slane %v972_v18, 1 }
 0x190   : > { %v974_v59 = vadd.f32 %v973_v37, %v972_v18  ;;  %981 = sbr.rel (%p1245_p8) target bundleno = 538 (0x21a), region = 48 }
 0x192   : > { %v975_v21 = vadd.f32 %v974_v59, %v840_v30 }
 0x194   : > { %977 = vst.msk [vmem:[#allocation2] sm:$0x1] %vm976_vm4, %v975_v21 }
 0x195   : > { %v984_v63 = vld [vmem:[%s1788_s3] sm:$0x3]  ;;  %vm989_vm5 = vcmask 189440   ;;  %vm995_vm6 = vcmask 1024  }
 0x196   : > { %v993_v26 = vld [vmem:[%s1789_s4] sm:$0x3] }
 0x19b   : > { %v982_v23 = vld [vmem:[#allocation2] sm:$0x1] }
 0x19c   : > { %v983_v61 = vmul.f32 0.0009765625, %v982_v23 }
 0x19e   : > { %v986_v50 = vperm.slane %v983_v61, 0 }
 0x1a0   : > { %v988_v27 = vmul.f32 %v986_v50, %v984_v63 }
 0x1a2   : > { %v990_v1 = vsel %vm989_vm5, %v988_v27, 0.0 }
 0x1a3   : > { %991 = vadd.xlane.f32.xlu0 %v990_v1 }
 0x216   : > { %v992_v49 = vpop.xlane.xlu0 %991 }
 0x217   : > { %v994_v32 = vadd.f32 %v993_v26, %v992_v49 }
 0x219   : > { %996 = vst.msk [vmem:[%s1440_s6] sm:$0x3] %vm995_vm6, %v994_v32 }
 0x21a PF: > { %s15_s22 = sadd.s32 1, %s1371_s22   ;;  %s1791_s18 = smov %s1363_s20 }
 0x21b   : > { %p12_p9 = scmp.ge.s32.totalorder %s15_s22, 6   ;;  %s1792_s19 = smov %s1367_s21 }
 0x21c   : > { %s1793_s20 = smov %s1796_s23  ;;  %s1794_s21 = smov %s1800_s24 }
 0x21d   :  { %14 = sbr.rel (!%p12_p9) target bundleno = 3 (0x3), region = 78 }

</bundles_post_ra>
